<compile_context>
chip_gen: v5e
topology: v5e:2x2
jax: 0.10.0
libtpu: 0.0.40
codegen_flags: <defaults>
</compile_context>

<pallas_src>
import functools

import jax
import jax.numpy as jnp
from jax.experimental import pallas as pl
from jax.experimental.pallas import tpu as pltpu


_VMEM_LIMIT = 32 * 1024 * 1024  # explicit scoped-VMEM raise (v5e default is only 16 MiB)


# ----------------------------------------------------------------------------
# Small helpers
# ----------------------------------------------------------------------------

def _round_up(x, m):
    return ((x + m - 1) // m) * m


def _cpad(c):
    # pad a channel / class count up to a lane-dense multiple of 128
    return _round_up(max(int(c), 1), 128)


def _pick_tile(dim, candidates):
    for c in candidates:
        if dim % c == 0:
            return c
    return dim


def _tile_m(M, cap=1024):
    """Pick (tm, Mp): tm divides Mp; Mp == M unless sublane-alignment padding is unavoidable."""
    if M % 8 == 0 and M <= cap:
        return M, M
    if M % 16 == 0:
        for t in range(cap - cap % 16, 0, -16):
            if M % t == 0:
                return t, M
    if M % 8 == 0:
        for t in range(cap - cap % 8, 0, -8):
            if M % t == 0:
                return t, M
    Mp = _round_up(M, 16)  # only tiny/odd M (e.g. M=2) hit this -> cheap edge padding
    if Mp <= cap:
        return Mp, Mp
    for t in range(cap - cap % 16, 0, -16):
        if Mp % t == 0:
            return t, Mp
    return 16, Mp


def _split_parallel(Mp, tm, Np, tn):
    # v7x has 2 TensorCores: make sure the parallel grid axes yield >= 2 blocks where possible.
    if (Mp // tm) * (Np // tn) >= 2:
        return tm, tn
    if tn % 256 == 0:
        return tm, tn // 2
    if tm % 16 == 0 and Mp % (tm // 2) == 0:
        return tm // 2, tn
    return tm, tn


# ----------------------------------------------------------------------------
# Pallas kernels
# ----------------------------------------------------------------------------

def _matmul_epi_kernel(a_ref, w_ref, shift_ref, *rest, relu, with_res):
    # Tiled matmul (BN scale pre-folded into w). Epilogue: +shift [+residual] [+ReLU].
    # a: (tm, tk) bf16, w: (tk, tn) bf16, shift: (1, tn) f32, [res: (tm, tn) bf16],
    # out: (tm, tn) bf16, acc scratch: (tm, tn) f32.
    if with_res:
        res_ref, o_ref, acc_ref = rest
    else:
        o_ref, acc_ref = rest

    k = pl.program_id(2)

    @pl.when(k == 0)
    def _():
        acc_ref[...] = jnp.zeros_like(acc_ref)

    acc_ref[...] += jnp.dot(a_ref[...], w_ref[...],
                            preferred_element_type=jnp.float32)

    @pl.when(k == pl.num_programs(2) - 1)
    def _():
        y = acc_ref[...] + shift_ref[...]
        if with_res:
            y = y + res_ref[...].astype(jnp.float32)
        if relu:
            y = jnp.maximum(y, 0.0)
        o_ref[...] = y.astype(o_ref.dtype)


def _conv3x3_kernel(*refs, nphase, stride, ho, wo, wo_c, relu):
    # Direct 3x3 conv on one (padded) image block: 9 shifted 1x1 matmuls accumulated in f32,
    # no im2col materialization in HBM. For stride 2 the input arrives as 4 even/odd phases so
    # every tap is a contiguous slice. wo_c is wo rounded up to 8 so in-kernel reshapes stay
    # sublane-aligned; extra columns are computed on zero padding and dropped at the store.
    phase_refs = refs[:nphase]
    w_ref, shift_ref, o_ref = refs[nphase:]
    cin = w_ref.shape[1]
    tn = w_ref.shape[2]

    acc = jnp.zeros((ho * wo_c, tn), jnp.float32)
    for kh in range(3):
        for kw in range(3):
            ph = phase_refs[(kh % stride) * stride + (kw % stride)]
            r0, c0 = kh // stride, kw // stride
            a = ph[0, r0:r0 + ho, c0:c0 + wo_c, :].reshape(ho * wo_c, cin)
            acc = acc + jnp.dot(a, w_ref[kh * 3 + kw],
                                preferred_element_type=jnp.float32)

    y = acc + shift_ref[...]
    if relu:
        y = jnp.maximum(y, 0.0)
    o_ref[0] = y.reshape(ho, wo_c, tn)[:, :wo, :].astype(o_ref.dtype)


def _maxpool3x3_kernel(p00, p01, p10, p11, o_ref, *, ho, wo):
    # 3x3 / stride-2 max-pool: running max over the 9 taps, taps read as contiguous slices of
    # the 4 even/odd phases of the padded input (input is post-ReLU so zero padding is exact).
    phases = ((p00, p01), (p10, p11))
    m = None
    for kh in range(3):
        for kw in range(3):
            v = phases[kh % 2][kw % 2][0, kh // 2:kh // 2 + ho, kw // 2:kw // 2 + wo, :]
            m = v if m is None else jnp.maximum(m, v)
    o_ref[0] = m


def _gap_head_kernel(x_ref, w_ref, b_ref, o_ref, acc_ref, *, inv_hw):
    # Fused global-average-pool + Linear head, gridded over (cout blocks, C accumulation blocks).
    # x: (N, HW, tc) bf16, w: (tc, tn) bf16, b: (1, tn) f32, out/acc: (N, tn) f32.
    k = pl.program_id(1)

    @pl.when(k == 0)
    def _():
        acc_ref[...] = jnp.zeros_like(acc_ref)

    f = (jnp.sum(x_ref[...].astype(jnp.float32), axis=1) * inv_hw).astype(jnp.bfloat16)
    acc_ref[...] += jnp.dot(f, w_ref[...], preferred_element_type=jnp.float32)

    @pl.when(k == pl.num_programs(1) - 1)
    def _():
        o_ref[...] = acc_ref[...] + b_ref[...]


# ----------------------------------------------------------------------------
# Kernel wrappers
# ----------------------------------------------------------------------------

def matmul_shift_act(a, w, shift, residual=None, relu=True, out_dtype=jnp.bfloat16):
    """o = act((a @ w) + shift [+ residual]) with a tiled, pipelined bf16 matmul (scale folded in w)."""
    M, K = a.shape
    Kw, Np = w.shape
    assert K == Kw and K % 128 == 0 and Np % 128 == 0, (a.shape, w.shape)

    tm, Mp = _tile_m(M)
    if Mp > M:
        a = jnp.pad(a, ((0, Mp - M), (0, 0)))
        if residual is not None:
            residual = jnp.pad(residual, ((0, Mp - M), (0, 0)))

    tn = _pick_tile(Np, (512, 384, 256, 128))
    tk = _pick_tile(K, (512, 384, 256, 128))
    tm, tn = _split_parallel(Mp, tm, Np, tn)

    with_res = residual is not None
    in_specs = [
        pl.BlockSpec((tm, tk), lambda i, j, k: (i, k)),
        pl.BlockSpec((tk, tn), lambda i, j, k: (k, j)),
        pl.BlockSpec((1, tn), lambda i, j, k: (0, j)),
    ]
    args = [a.astype(jnp.bfloat16), w, shift]
    if with_res:
        in_specs.append(pl.BlockSpec((tm, tn), lambda i, j, k: (i, j)))
        args.append(residual.astype(jnp.bfloat16))

    kernel = functools.partial(_matmul_epi_kernel, relu=relu, with_res=with_res)

    out = pl.pallas_call(
        kernel,
        out_shape=jax.ShapeDtypeStruct((Mp, Np), out_dtype),
        grid_spec=pltpu.PrefetchScalarGridSpec(
            num_scalar_prefetch=0,
            grid=(Mp // tm, Np // tn, K // tk),
            in_specs=in_specs,
            out_specs=pl.BlockSpec((tm, tn), lambda i, j, k: (i, j)),
            scratch_shapes=[pltpu.VMEM((tm, tn), jnp.float32)],
        ),
        compiler_params=pltpu.CompilerParams(
            dimension_semantics=("parallel", "parallel", "arbitrary"),
            vmem_limit_bytes=_VMEM_LIMIT,
        ),
    )(*args)
    return out[:M] if Mp > M else out


def conv1x1_bn(x, cp, stride=1, relu=True, residual=None):
    """1x1 conv + folded BN (+ fused residual) (+ ReLU); pure matmul, no padding round trips."""
    if stride > 1:
        x = x[:, ::stride, ::stride, :]
    n, h, w_, c = x.shape
    a = x.reshape(n * h * w_, c)                       # free bitcast reshape (c is lane-dense)
    res2 = None
    if residual is not None:
        res2 = residual.reshape(n * h * w_, cp["cout_pad"])
    y = matmul_shift_act(a, cp["w"], cp["shift"], residual=res2, relu=relu)
    return y.reshape(n, h, w_, cp["cout_pad"])


def _im2col(x, kh, kw, stride, pad):
    # Stem-only im2col (runs once; inflation is modest). Feature order (kh, kw, C) matches
    # weight.reshape(kh*kw*C, Cout) for weights stored as (kh, kw, Cin, Cout).
    if pad:
        x = jnp.pad(x, ((0, 0), (pad, pad), (pad, pad), (0, 0)))
    n, hp, wp, c = x.shape
    ho = (hp - kh) // stride + 1
    wo = (wp - kw) // stride + 1
    cols = [x[:, i:i + stride * ho:stride, j:j + stride * wo:stride, :]
            for i in range(kh) for j in range(kw)]
    patches = jnp.concatenate(cols, axis=-1)
    return patches.reshape(n * ho * wo, kh * kw * c), (n, ho, wo)


def stem_conv(x, cp):
    """7x7/2 stem conv + BN + ReLU via im2col matmul (K padded 147 -> 256)."""
    a, (n, ho, wo) = _im2col(x, 7, 7, 2, 3)
    if a.shape[1] < cp["Kp"]:
        a = jnp.pad(a, ((0, 0), (0, cp["Kp"] - a.shape[1])))
    y = matmul_shift_act(a, cp["w"], cp["shift"], relu=True)
    return y.reshape(n, ho, wo, cp["cout_pad"])


def conv3x3_bn(x, cp, stride, relu=True):
    """3x3 conv + folded BN (+ ReLU) as a direct conv kernel (no im2col in HBM)."""
    assert stride in (1, 2)
    n, h, w_, c = x.shape
    ho = (h - 1) // stride + 1
    wo = (w_ - 1) // stride + 1
    wo_c = _round_up(wo, 8)                                   # keeps in-kernel reshapes aligned
    hp = max(h + 2, stride * (ho - 1) + 3)
    wp = max(w_ + 2, stride * (wo_c - 1) + 3)
    if stride == 2:
        hp, wp = _round_up(hp, 2), _round_up(wp, 2)

    xpad = jnp.pad(x, ((0, 0), (1, hp - h - 1), (1, wp - w_ - 1), (0, 0)))
    if stride == 1:
        phases = [xpad]
    else:
        # even/odd row x column phases: each tap becomes a contiguous slice of one phase.
        phases = [xpad[:, a:hp:2, b:wp:2, :] for a in range(2) for b in range(2)]

    cout_pad = cp["cout_pad"]
    tn = _pick_tile(cout_pad, (512, 384, 256, 128))
    ph_shape = phases[0].shape
    kernel = functools.partial(_conv3x3_kernel, nphase=len(phases), stride=stride,
                               ho=ho, wo=wo, wo_c=wo_c, relu=relu)

    in_specs = ([pl.BlockSpec((1,) + ph_shape[1:], lambda b, j: (b, 0, 0, 0))
                 for _ in phases]
                + [pl.BlockSpec((9, c, tn), lambda b, j: (0, 0, j)),
                   pl.BlockSpec((1, tn), lambda b, j: (0, j))])

    out = pl.pallas_call(
        kernel,
        out_shape=jax.ShapeDtypeStruct((n, ho, wo, cout_pad), jnp.bfloat16),
        grid_spec=pltpu.PrefetchScalarGridSpec(
            num_scalar_prefetch=0,
            grid=(n, cout_pad // tn),
            in_specs=in_specs,
            out_specs=pl.BlockSpec((1, ho, wo, tn), lambda b, j: (b, 0, 0, j)),
        ),
        compiler_params=pltpu.CompilerParams(
            dimension_semantics=("parallel", "parallel"),
            vmem_limit_bytes=_VMEM_LIMIT,
        ),
    )(*phases, cp["w"], cp["shift"])
    return out


def maxpool_3x3_s2(x):
    """3x3 / stride-2 / pad-1 max-pool; taps computed in-kernel from 4 even/odd phases."""
    n, h, w_, c = x.shape
    ho = (h - 1) // 2 + 1
    wo = (w_ - 1) // 2 + 1
    hp = _round_up(max(h + 2, 2 * (ho - 1) + 3), 2)
    wp = _round_up(max(w_ + 2, 2 * (wo - 1) + 3), 2)
    xpad = jnp.pad(x, ((0, 0), (1, hp - h - 1), (1, wp - w_ - 1), (0, 0)))
    phases = [xpad[:, a:hp:2, b:wp:2, :] for a in range(2) for b in range(2)]

    tc = _pick_tile(c, (512, 384, 256, 128))
    ph_shape = phases[0].shape
    kernel = functools.partial(_maxpool3x3_kernel, ho=ho, wo=wo)

    return pl.pallas_call(
        kernel,
        out_shape=jax.ShapeDtypeStruct((n, ho, wo, c), x.dtype),
        grid_spec=pltpu.PrefetchScalarGridSpec(
            num_scalar_prefetch=0,
            grid=(n, c // tc),
            in_specs=[pl.BlockSpec((1, ph_shape[1], ph_shape[2], tc),
                                   lambda b, j: (b, 0, 0, j)) for _ in range(4)],
            out_specs=pl.BlockSpec((1, ho, wo, tc), lambda b, j: (b, 0, 0, j)),
        ),
        compiler_params=pltpu.CompilerParams(
            dimension_semantics=("parallel", "parallel"),
            vmem_limit_bytes=_VMEM_LIMIT,
        ),
    )(*phases)


def gap_head(x, head):
    """Fused global-average-pool + Linear head, gridded (cout parallel, C accumulation)."""
    n, h, w_, c = x.shape
    hw = h * w_
    x3 = x.reshape(n, hw, c)
    ncp = head["w"].shape[1]
    tn = _pick_tile(ncp, (512, 384, 256, 128))
    tc = _pick_tile(c, (512, 384, 256, 128))
    kernel = functools.partial(_gap_head_kernel, inv_hw=1.0 / hw)

    out = pl.pallas_call(
        kernel,
        out_shape=jax.ShapeDtypeStruct((n, ncp), jnp.float32),
        grid_spec=pltpu.PrefetchScalarGridSpec(
            num_scalar_prefetch=0,
            grid=(ncp // tn, c // tc),
            in_specs=[pl.BlockSpec((n, hw, tc), lambda j, k: (0, 0, k)),
                      pl.BlockSpec((tc, tn), lambda j, k: (k, j)),
                      pl.BlockSpec((1, tn), lambda j, k: (0, j))],
            out_specs=pl.BlockSpec((n, tn), lambda j, k: (0, j)),
            scratch_shapes=[pltpu.VMEM((n, tn), jnp.float32)],
        ),
        compiler_params=pltpu.CompilerParams(
            dimension_semantics=("parallel", "arbitrary"),
            vmem_limit_bytes=_VMEM_LIMIT,
        ),
    )(x3, head["w"], head["b"])
    return out[:, :head["num_classes"]]


# ----------------------------------------------------------------------------
# Parameter initialization (deterministic, synthetic) + TPU-friendly prep
# ----------------------------------------------------------------------------

def _init_conv_bn(key, cin, cout, k, eps=1e-5):
    k1, k2, k3, k4, k5 = jax.random.split(key, 5)
    w = jax.random.normal(k1, (k, k, cin, cout), jnp.float32) * (2.0 / (k * k * cin)) ** 0.5
    gamma = 1.0 + 0.1 * jax.random.normal(k2, (cout,), jnp.float32)
    beta = 0.1 * jax.random.normal(k3, (cout,), jnp.float32)
    mean = 0.1 * jax.random.normal(k4, (cout,), jnp.float32)
    var = jnp.abs(jax.random.normal(k5, (cout,), jnp.float32)) + 0.5
    # Fold inference-mode BatchNorm into an affine applied after the conv.
    scale = gamma / jnp.sqrt(var + eps)
    shift = beta - mean * scale
    return {"w": w, "scale": scale, "shift": shift}


def _init_bottleneck(key, cin, width, cout, stride):
    keys = jax.random.split(key, 4)
    p = {
        "stride": stride,
        "conv1": _init_conv_bn(keys[0], cin, width, 1),
        "conv2": _init_conv_bn(keys[1], width, width, 3),
        "conv3": _init_conv_bn(keys[2], width, cout, 1),
    }
    if stride != 1 or cin != cout:
        p["downsample"] = _init_conv_bn(keys[3], cin, cout, 1)
    return p


def _init_linear(key, din, dout):
    k1, k2 = jax.random.split(key)
    return {
        "w": jax.random.normal(k1, (din, dout), jnp.float32) / din ** 0.5,
        "b": 0.01 * jax.random.normal(k2, (dout,), jnp.float32),
    }


def init_classifier_params(key, num_classes=10, width_base=8, blocks=(1, 1, 1, 1)):
    keys = jax.random.split(key, 3 + len(blocks))
    params = {"stem": _init_conv_bn(keys[0], 3, width_base, 7)}
    cin = width_base
    stages = []
    for s_idx, nblocks in enumerate(blocks):
        width = width_base * (2 ** s_idx)
        cout = width * 4  # bottleneck expansion = 4
        stride = 1 if s_idx == 0 else 2
        bkeys = jax.random.split(keys[1 + s_idx], nblocks)
        stage = []
        for b in range(nblocks):
            stage.append(_init_bottleneck(bkeys[b], cin, width, cout,
                                          stride if b == 0 else 1))
            cin = cout
        stages.append(stage)
    params["stages"] = stages
    feat_dim = cin
    params["head_source"] = _init_linear(keys[-2], feat_dim, num_classes)
    params["head_target"] = _init_linear(keys[-1], feat_dim, num_classes)
    return params, feat_dim


def _prep_conv(p, cin_pad):
    # Fold BN scale into the weights (f32 math, then bf16), pad channels to 128-lane multiples.
    # Padded output channels get zero weight columns and zero shift -> padded lanes stay exactly 0.
    kh, kw, cin, cout = p["w"].shape
    cout_pad = _cpad(cout)
    w = p["w"].astype(jnp.float32) * p["scale"].astype(jnp.float32)[None, None, None, :]
    w = jnp.pad(w, ((0, 0), (0, 0), (0, cin_pad - cin), (0, cout_pad - cout)))
    shift = jnp.pad(p["shift"].astype(jnp.float32), (0, cout_pad - cout)).reshape(1, cout_pad)
    out = {"k": kh, "cout": cout, "cout_pad": cout_pad, "shift": shift}
    if kh == 1:
        out["w"] = w.reshape(cin_pad, cout_pad).astype(jnp.bfloat16)
    elif kh == 3:
        out["w"] = w.reshape(9, cin_pad, cout_pad).astype(jnp.bfloat16)   # indexed by kh*3+kw
    else:  # 7x7 stem -> im2col weight matrix, K padded to a 128-multiple (147 -> 256)
        K = kh * kw * cin_pad
        Kp = _round_up(K, 128)
        out["w"] = jnp.pad(w.reshape(K, cout_pad), ((0, Kp - K), (0, 0))).astype(jnp.bfloat16)
        out["Kp"] = Kp
    return out


def prepare_params(params):
    pp = {"stem": _prep_conv(params["stem"], cin_pad=3)}  # stem sees the raw 3-channel image
    stages = []
    for stage in params["stages"]:
        pstage = []
        for blk in stage:
            _, _, cin, width = blk["conv1"]["w"].shape
            cin_pad = _cpad(cin)
            width_pad = _cpad(width)
            pb = {
                "stride": blk["stride"],
                "conv1": _prep_conv(blk["conv1"], cin_pad=cin_pad),
                "conv2": _prep_conv(blk["conv2"], cin_pad=width_pad),
                "conv3": _prep_conv(blk["conv3"], cin_pad=width_pad),
            }
            if "downsample" in blk:
                pb["downsample"] = _prep_conv(blk["downsample"], cin_pad=cin_pad)
            pstage.append(pb)
        stages.append(pstage)
    pp["stages"] = stages
    for name in ("head_source", "head_target"):
        h = params[name]
        din, dout = h["w"].shape
        din_pad, dout_pad = _cpad(din), _cpad(dout)
        pp[name] = {
            "w": jnp.pad(h["w"], ((0, din_pad - din), (0, dout_pad - dout))).astype(jnp.bfloat16),
            "b": jnp.pad(h["b"], (0, dout_pad - dout)).reshape(1, dout_pad).astype(jnp.float32),
            "num_classes": dout,
        }
    return pp


# ----------------------------------------------------------------------------
# Forward pass
# ----------------------------------------------------------------------------

def bottleneck_forward(x, bp):
    stride = bp["stride"]
    if "downsample" in bp:
        identity = conv1x1_bn(x, bp["downsample"], stride=stride, relu=False)
    else:
        identity = x
    out = conv1x1_bn(x, bp["conv1"], stride=1, relu=True)               # 1x1
    out = conv3x3_bn(out, bp["conv2"], stride=stride, relu=True)        # 3x3 (stride here), direct conv
    # 1x1 expansion; residual add + ReLU fused into the matmul epilogue.
    out = conv1x1_bn(out, bp["conv3"], stride=1, relu=True, residual=identity)
    return out


def classifier_forward(params, x_nchw, task="source"):
    """Equivalent of Classifier.forward: returns logits of the current head (default 'source')."""
    x = jnp.transpose(x_nchw.astype(jnp.float32), (0, 2, 3, 1)).astype(jnp.bfloat16)  # NCHW -> NHWC
    x = stem_conv(x, params["stem"])                              # 7x7/2 conv + BN + ReLU
    x = maxpool_3x3_s2(x)                                         # 3x3/2 max-pool
    for stage in params["stages"]:
        for blk in stage:
            x = bottleneck_forward(x, blk)
    head = params["head_source"] if task == "source" else params["head_target"]
    return gap_head(x, head)                                      # fused GAP + Linear head


# ----------------------------------------------------------------------------
# Main
# ----------------------------------------------------------------------------

if __name__ == "__main__":
    key = jax.random.PRNGKey(0)
    k_in, k_par = jax.random.split(key)

    # NCHW input, as PyTorch would feed the backbone.
    x = jax.random.normal(k_in, (2, 3, 32, 32), jnp.float32)

    num_classes = 10
    raw_params, feat_dim = init_classifier_params(k_par, num_classes=num_classes)
    params = prepare_params(raw_params)

    y = classifier_forward(params, x, task="source")
    y = jax.block_until_ready(y)

    assert y.shape == (2, num_classes), y.shape
    assert y.dtype == jnp.float32
    assert bool(jnp.all(jnp.isfinite(y)))
    print("KERNEL_OK")
</pallas_src>

<mosaic_0001>
module attributes {stable_mosaic.version = 11 : i64} {
  func.func @_matmul_epi_kernel(%arg0: i32, %arg1: i32, %arg2: i32, %arg3: memref<256x256xbf16, #tpu.memory_space<vmem>>, %arg4: memref<256x128xbf16, #tpu.memory_space<vmem>>, %arg5: memref<1x128xf32, #tpu.memory_space<vmem>>, %arg6: memref<256x128xbf16, #tpu.memory_space<vmem>>, %arg7: memref<256x128xf32, #tpu.memory_space<vmem>>) attributes {dimension_semantics = [#tpu.dimension_semantics<parallel>, #tpu.dimension_semantics<parallel>, #tpu.dimension_semantics<arbitrary>], iteration_bounds = array<i64: 2, 1, 1>, scalar_prefetch = 0 : i64, scratch_operands = 1 : i64, tpu.core_type = #tpu.core_type<tc>, window_params = [{transform_indices = @transform_0, window_bounds = array<i64: 256, 256>}, {transform_indices = @transform_1, window_bounds = array<i64: 256, 128>}, {transform_indices = @transform_2, window_bounds = array<i64: 1, 128>}, {transform_indices = @transform_3, window_bounds = array<i64: 256, 128>}]} {
    %c0_i32 = arith.constant 0 : i32
    %0 = arith.cmpi eq, %arg2, %c0_i32 : i32
    %1 = arith.extui %0 : i1 to i32
    %c0_i32_0 = arith.constant 0 : i32
    %2 = arith.cmpi ne, %1, %c0_i32_0 : i32
    scf.if %2 {
      %cst_10 = arith.constant 0.000000e+00 : f32
      %12 = vector.broadcast %cst_10 : f32 to vector<256x128xf32>
      %c0_11 = arith.constant 0 : index
      %c0_12 = arith.constant 0 : index
      %13 = vector.load %arg7[%c0_11, %c0_12] : memref<256x128xf32, #tpu.memory_space<vmem>>, vector<256x128xf32>
      tpu.vector_store %arg7[%c0_11, %c0_12], %12 {strides = array<i32>} : memref<256x128xf32, #tpu.memory_space<vmem>>, vector<256x128xf32>,
    } else {
    }
    %c0 = arith.constant 0 : index
    %c0_1 = arith.constant 0 : index
    %3 = vector.load %arg7[%c0, %c0_1] : memref<256x128xf32, #tpu.memory_space<vmem>>, vector<256x128xf32>
    %c0_2 = arith.constant 0 : index
    %c0_3 = arith.constant 0 : index
    %4 = vector.load %arg3[%c0_2, %c0_3] : memref<256x256xbf16, #tpu.memory_space<vmem>>, vector<256x256xbf16>
    %c0_4 = arith.constant 0 : index
    %c0_5 = arith.constant 0 : index
    %5 = vector.load %arg4[%c0_4, %c0_5] : memref<256x128xbf16, #tpu.memory_space<vmem>>, vector<256x128xbf16>
    %cst = arith.constant dense<0.000000e+00> : vector<256x128xf32>
    %6 = tpu.matmul %4, %5, %cst {dimension_numbers = #tpu.dot_dimension_numbers<[1], [0], [0], [1], [0, 0, 1, 1], [], []>} : vector<256x256xbf16>, vector<256x128xbf16>, vector<256x128xf32> -> vector<256x128xf32>
    %7 = arith.addf %3, %6 : vector<256x128xf32>
    %c0_6 = arith.constant 0 : index
    %c0_7 = arith.constant 0 : index
    %8 = vector.load %arg7[%c0_6, %c0_7] : memref<256x128xf32, #tpu.memory_space<vmem>>, vector<256x128xf32>
    tpu.vector_store %arg7[%c0_6, %c0_7], %7 {strides = array<i32>} : memref<256x128xf32, #tpu.memory_space<vmem>>, vector<256x128xf32>,
    %c0_i32_8 = arith.constant 0 : i32
    %9 = arith.cmpi eq, %arg2, %c0_i32_8 : i32
    %10 = arith.extui %9 : i1 to i32
    %c0_i32_9 = arith.constant 0 : i32
    %11 = arith.cmpi ne, %10, %c0_i32_9 : i32
    scf.if %11 {
      %c0_10 = arith.constant 0 : index
      %c0_11 = arith.constant 0 : index
      %12 = vector.load %arg7[%c0_10, %c0_11] : memref<256x128xf32, #tpu.memory_space<vmem>>, vector<256x128xf32>
      %c0_12 = arith.constant 0 : index
      %c0_13 = arith.constant 0 : index
      %13 = vector.load %arg5[%c0_12, %c0_13] : memref<1x128xf32, #tpu.memory_space<vmem>>, vector<1x128xf32>
      %14 = vector.broadcast %13 : vector<1x128xf32> to vector<256x128xf32>
      %15 = arith.addf %12, %14 : vector<256x128xf32>
      %cst_14 = arith.constant 0.000000e+00 : f32
      %16 = vector.broadcast %cst_14 : f32 to vector<256x128xf32>
      %17 = arith.maximumf %15, %16 : vector<256x128xf32>
      %18 = arith.truncf %17 : vector<256x128xf32> to vector<256x128xbf16>
      %c0_15 = arith.constant 0 : index
      %c0_16 = arith.constant 0 : index
      %19 = vector.load %arg6[%c0_15, %c0_16] : memref<256x128xbf16, #tpu.memory_space<vmem>>, vector<256x128xbf16>
      tpu.vector_store %arg6[%c0_15, %c0_16], %18 {strides = array<i32>} : memref<256x128xbf16, #tpu.memory_space<vmem>>, vector<256x128xbf16>,
    } else {
    }
    return
  }
  func.func @transform_0(%arg0: i32, %arg1: i32, %arg2: i32) -> (i32, i32) {
    %c0_i32 = arith.constant 0 : i32
    return %arg0, %arg2 : i32, i32
  }
  func.func @transform_1(%arg0: i32, %arg1: i32, %arg2: i32) -> (i32, i32) {
    %c0_i32 = arith.constant 0 : i32
    return %arg2, %arg1 : i32, i32
  }
  func.func @transform_2(%arg0: i32, %arg1: i32, %arg2: i32) -> (i32, i32) {
    %c0_i32 = arith.constant 0 : i32
    %c0_i32_0 = arith.constant 0 : i32
    return %c0_i32, %arg1 : i32, i32
  }
  func.func @transform_3(%arg0: i32, %arg1: i32, %arg2: i32) -> (i32, i32) {
    %c0_i32 = arith.constant 0 : i32
    return %arg0, %arg1 : i32, i32
  }
}

</mosaic_0001>

<bundles_post_ra>
// kernel: tpu_custom_call.1
= control target key start
LH: loop header
LB: loop body
LE: loop exit
PB: predicated region body
PF: predicated region fallthrough
CT: control target
= control target key end

     0   :  { %s2092_s0 = inlined_call_operand.hbm [shape: bf16[512,256], index: 0, kind: input, shape index: {}]   ;;  %s2093_s1 = inlined_call_operand.hbm [shape: bf16[256,128], index: 1, kind: input, shape index: {}]   ;;  %s2094_s2 = inlined_call_operand.vmem [shape: f32[1,128], index: 2, kind: input, shape index: {}]   ;;  %s2095_s3 = inlined_call_operand.hbm [shape: bf16[512,128], index: 3, kind: output, shape index: {}]  }
   0x1   :  { %2096 = sst [smem:[#allocation12_spill]] %s2093_s1 }
   0x2   :  { %8 = vsyncpa [#allocation4], 0 }
   0x3   :  { %10 = vsyncpa [#allocation4 + $0x1], 0 }
   0x4   :  { %11 = vsyncpa [#allocation7], 0 }
   0x5   :  { %12 = vsyncpa [#allocation5], 0 }
   0x6   :  { %14 = vsyncpa [#allocation5 + $0x1], 0  ;;  %s1820_s12 = smov 0   ;;  %s1822_s13 = smov 0  }
   0x7   :  { %s1824_s14 = smov 0   ;;  %s1826_s15 = smov 0  }
   0x8   :  { %s1828_s16 = smov 0   ;;  %s1830_s17 = smov 0  }
   0x9 LB: > { %s1192_s18 = sadd.s32 4294967295, %s1791_s17   ;;  %s1193_s19 = sadd.s32 4294967294, %s1791_s17   ;;  %s1791_s17 = sphi %s1830_s17, %s20_s17   ;;  %s1787_s16 = sphi %s1828_s16, %s2109_s16   ;;  %s1783_s15 = sphi %s1826_s15, %s2108_s15   ;;  %s1779_s14 = sphi %s1824_s14, %s2107_s14   ;;  %s1775_s13 = sphi %s1822_s13, %s2106_s13   ;;  %s1771_s12 = sphi %s1820_s12, %s2105_s12  }
   0xa   : > { %p61_p0 = scmp.ne.s32.totalorder %s1775_s13, %s1771_s12  ;;  %p1854_p1 = scmp.eq.s32.totalorder %s1192_s18, 0 }
   0xb   : > { %p1858_p2 = scmp.eq.s32.totalorder %s1192_s18, 1  ;;  %p147_p3 = scmp.eq.s32.totalorder %s1193_s19, 1 }
   0xc   : > { %p1864_p4 = por %p1854_p1, %p61_p0  ;;  %p1194_p5 = scmp.ge.s32.totalorder %s1791_s17, 1 }
   0xd   : > { %p1869_p6 = por %p147_p3, %p61_p0  ;;  %p154_p7 = scmp.lt.s32.totalorder %s1791_s17, 3 }
   0xe   : > { %s2101_s1 = sld [smem:[#allocation12_spill]]  ;;  %s1793_s28 = smov [#allocation6]  }
   0xf   : > { %p1877_p8 = pnand %p1194_p5, %p154_p7  ;;  %s171_s29 = sshll.u32 %s1793_s28, 4  ;;  %s172_s29 = int_to_ptr.vmem [resolvable:$true] %s171_s29 }
  0x10   : > { %p1197_p11 = scmp.ge.s32.totalorder %s1791_s17, 2  ;;  %s1794_s30 = smov 64  }
  0x11   : > { %p1573_p9 = pneg %p1877_p8  ;;  %s1795_s4 = smov 4  }
  0x12   : > { %s39_s5 = sadd.s32 1, %s1787_s16  ;;  %s48_s6 = sadd.s32 1, %s1779_s14 }
  0x13   : > { %p1574_p10 = pnand %p1573_p9, %p1854_p1  ;;  %p41_p12 = scmp.ge.s32.totalorder %s39_s5, 2 }
  0x14   : > { %s169_s26 = sshll.u32 %s2101_s1, 4  ;;  %p55_p13 = scmp.ne.s32.totalorder %s1779_s14, %s1775_s13  ;;  %s170_s26 = int_to_ptr.hbm [resolvable:$true] %s169_s26 }
  0x15   : > { %1576 = dma.hbm_to_vmem [thread:$0]  (!%p1574_p10), %s170_s26, 2048, %s172_s29, [#allocation7], %s1794_s30, %s1794_s30, %s1795_s4  }
  0x16   : > { %p56_p0 = scmp.eq.s32.totalorder %s1791_s17, 0  ;;  %s2111_s5 = smov (%p41_p12, %s39_s5), 0 }
  0x17   : > { %p1899_p5 = por %p1858_p2, %p55_p13  ;;  %s43_s9 = ssub.s32 %s1787_s16, %s2111_s5 }
  0x18   : > { %p1893_p3 = por %p56_p0, %p55_p13  ;;  %p1586_p7 = scmp.lt.s32.totalorder %s1791_s17, 2 }
  0x19   : > { %p46_p9 = scmp.eq.s32.totalorder %s43_s9, 0  ;;  %s191_s10 = sand.u32 1, %s1779_s14  }
  0x1a   : > { %s1198_s11 = sshll.u32 %s191_s10, 8  ;;  %s1404_s19 = sshll.u32 %s1787_s16, 8 }
  0x1b   : > { %s1908_s18 = scalar_select %p46_p9, %s1779_s14, %s48_s6  }
  0x1c   : > { %s203_s26 = scalar_lea.hbm %s2092_s0, %s1404_s19  ;;  %s195_s28 = scalar_lea.vmem [#allocation3], %s1198_s11 }
  0x1d   : > { %s206_s29 = sshll.u32 %s195_s28, 4  ;;  %s204_s21 = sshll.u32 %s203_s26, 4  ;;  %s207_s29 = int_to_ptr.vmem [resolvable:$true] %s206_s29  ;;  %s205_s21 = int_to_ptr.hbm [resolvable:$true] %s204_s21 }
  0x1e   : > { %p1578_p2 = pnand %p1586_p7, %p1893_p3  ;;  %s192_s30 = scalar_lea.sflag [#allocation4], %s191_s10 }
  0x1f   : > { %s1796_s4 = smov 128   ;;  %s1797_s1 = smov 8  }
  0x20   : > { %1580 = dma.hbm_to_vmem [thread:$0]  (!%p1578_p2), %s205_s21, 4096, %s207_s29, %s192_s30, %s1796_s4, %s1796_s4, %s1797_s1  }
  0x21   : > { %218 = sbr.rel (%p1877_p8) target bundleno = 338 (0x152), region = 32  ;;  %s1919_s6 = sand.u32 (!%p1877_p8), 1, %s1775_s13  }
  0x22   : > { %s1203_s9 = sshll.u32 (!%p1877_p8), %s1919_s6, 8  ;;  %s221_s11 = scalar_lea.sflag (!%p1877_p8), [#allocation4], %s1919_s6 }
  0x23   : > { %s1923_s19 = scalar_lea.vmem (!%p1877_p8), [#allocation3], %s1203_s9 }
  0x26   : > { %1758 = dma.done.wait (%p1864_p4), %s221_s11, 4096  }
  0x27   : > { %1760 = vsyncadd (%p1864_p4), %s221_s11, 4294963200 }
  0x28   : > { %1762 = dma.done.wait (%p1854_p1), [#allocation7], 2048  }
  0x29   : > { %1764 = vsyncadd (%p1854_p1), [#allocation7], 4294965248  ;;  %v1444_v0 = vld [vmem:[#allocation6 + $0x38] sm:$0xff]  ;;  %v1443_v2 = vld [vmem:[#allocation6 + $0x30] sm:$0xff]  ;;  %s1205_s22 = sshll.u32 %s1919_s6, 7  ;;  %s1453_s7 = sshll.u32 %s1783_s15, 7 }
  0x2a   : > { %v1452_v1 = vld [vmem:[#allocation6 + $0x78] sm:$0xff]  ;;  %651 = vmatpush.bf16.msra.mxu0 %v1444_v0  ;;  %1549 = vmatpush.bf16.msra.mxu2 %v1444_v0  ;;  %v1451_v3 = vld [vmem:[#allocation6 + $0x70] sm:$0xff]  ;;  %v1442_v4 = vld [vmem:[#allocation6 + $0x28] sm:$0xff]  ;;  %s2006_s27 = scalar_lea.vmem [#allocation8], %s1205_s22  ;;  %s1073_s25 = scalar_lea.hbm %s2095_s3, %s1453_s7 }
  0x2b   : > { %740 = vmatpush.bf16.msra.mxu1 %v1452_v1  ;;  %1557 = vmatpush.bf16.msra.mxu3 %v1452_v1  ;;  %v1450_v5 = vld [vmem:[#allocation6 + $0x68] sm:$0xff]  ;;  %v1441_v6 = vld [vmem:[#allocation6 + $0x20] sm:$0xff]  ;;  %v1440_v8 = vld [vmem:[#allocation6 + $0x18] sm:$0xff]  ;;  %s1074_s26 = sshll.u32 %s2006_s27, 4  ;;  %s1076_s15 = sshll.u32 %s1073_s25, 4  ;;  %s1075_s26 = int_to_ptr.vmem [resolvable:$true] %s1074_s26  ;;  %s1077_s15 = int_to_ptr.hbm [resolvable:$true] %s1076_s15 }
  0x2c   : > { %v1449_v7 = vld [vmem:[#allocation6 + $0x60] sm:$0xff]  ;;  %v1448_v9 = vld [vmem:[#allocation6 + $0x58] sm:$0xff]  ;;  %v1439_v10 = vld [vmem:[#allocation6 + $0x10] sm:$0xff]  ;;  %s1061_s28 = scalar_lea.sflag [#allocation5], %s1919_s6  ;;  %s1719_s29 = sshra.s32 %s1077_s15, 4  ;;  %s1720_s29 = int_to_ptr.hbm [resolvable:$true] %s1719_s29 }
  0x2d   : > { %v1447_v11 = vld [vmem:[#allocation6 + $0x50] sm:$0xff]  ;;  %v1438_v12 = vld [vmem:[#allocation6 + $0x8] sm:$0xff]  ;;  %v1437_v14 = vld [vmem:[#allocation6] sm:$0xff]  ;;  %s1721_s21 = scalar_lea.hbm %s1720_s29, 128  ;;  %s1725_s9 = scalar_lea.hbm %s2095_s3, 256 }
  0x2e   : > { %652 = vmatpush.bf16.msra.mxu0 %v1443_v2  ;;  %1550 = vmatpush.bf16.msra.mxu2 %v1443_v2  ;;  %v1446_v13 = vld [vmem:[#allocation6 + $0x48] sm:$0xff]  ;;  %v1445_v15 = vld [vmem:[#allocation6 + $0x40] sm:$0xff]  ;;  %v1216_v28 = vld [vmem:[%s1923_s19 + $0x10] sm:$0xf]  ;;  %p1722_p1 = scmp.ne.s32.totalorder %s1720_s29, %s1721_s21  ;;  %p1726_p10 = scmp.lt.s32.totalorder %s1720_s29, %s2095_s3 }
  0x2f   : > { %741 = vmatpush.bf16.msra.mxu1 %v1451_v3  ;;  %1558 = vmatpush.bf16.msra.mxu3 %v1451_v3  ;;  %v1208_v16 = vld [vmem:[%s1923_s19] sm:$0xf]  ;;  %v1406_v17 = vld [vmem:[%s1923_s19 + $0x4] sm:$0xf0]  ;;  %v1405_v20 = vld [vmem:[%s1923_s19 + $0x4] sm:$0xf]  ;;  %p1727_p12 = scmp.lt.s32.totalorder %s1725_s9, %s1721_s21 }
  0x30   : > { %v1272_v18 = vld [vmem:[%s1923_s19 + $0x80] sm:$0xf]  ;;  %v1422_v19 = vld [vmem:[%s1923_s19 + $0x84] sm:$0xf0]  ;;  %v1210_v21 = vld [vmem:[%s1923_s19 + $0x8] sm:$0xf0]  ;;  %v1209_v24 = vor.u32 %v1406_v17, %v1208_v16  ;;  %p1723_p4 = pnand %p1722_p1, %p1899_p5 }
  0x31   : > { %v1421_v22 = vld [vmem:[%s1923_s19 + $0x84] sm:$0xf]  ;;  %v1274_v23 = vld [vmem:[%s1923_s19 + $0x88] sm:$0xf0]  ;;  %v1273_v25 = vor.u32 %v1422_v19, %v1272_v18  ;;  %v1213_v26 = vor.u32 %v1405_v20, %v1210_v21  ;;  %v1408_v29 = vld [vmem:[%s1923_s19 + $0x14] sm:$0xf0]  ;;  %p1728_p13 = por %p1727_p12, %p1726_p10 }
  0x32   : > { %653 = vmatpush.bf16.msra.mxu0 %v1442_v4  ;;  %1551 = vmatpush.bf16.msra.mxu2 %v1442_v4  ;;  %v1277_v27 = vor.u32 %v1421_v22, %v1274_v23  ;;  %v1280_v30 = vld [vmem:[%s1923_s19 + $0x90] sm:$0xf]  ;;  %v1424_v31 = vld [vmem:[%s1923_s19 + $0x94] sm:$0xf0]  ;;  %v1407_v32 = vld [vmem:[%s1923_s19 + $0x14] sm:$0xf]  ;;  %v1217_v36 = vor.u32 %v1408_v29, %v1216_v28  ;;  %p1724_p8 = pneg %p1723_p4 }
  0x33   : > { %742 = vmatpush.bf16.msra.mxu1 %v1450_v5  ;;  %1559 = vmatpush.bf16.msra.mxu3 %v1450_v5  ;;  %v1218_v33 = vld [vmem:[%s1923_s19 + $0x18] sm:$0xf0]  ;;  %v1423_v34 = vld [vmem:[%s1923_s19 + $0x94] sm:$0xf]  ;;  %v1281_v37 = vor.u32 %v1424_v31, %v1280_v30  ;;  %v1224_v40 = vld [vmem:[%s1923_s19 + $0x20] sm:$0xf] }
  0x34   : > { %v1282_v35 = vld [vmem:[%s1923_s19 + $0x98] sm:$0xf0]  ;;  %v1221_v38 = vor.u32 %v1407_v32, %v1218_v33  ;;  %v1410_v41 = vld [vmem:[%s1923_s19 + $0x24] sm:$0xf0]  ;;  %v1288_v42 = vld [vmem:[%s1923_s19 + $0xa0] sm:$0xf]  ;;  %p1729_p0 = pnand %p1728_p13, %p1724_p8 }
  0x35   : > { %v1285_v39 = vor.u32 %v1423_v34, %v1282_v35  ;;  %v1426_v43 = vld [vmem:[%s1923_s19 + $0xa4] sm:$0xf0]  ;;  %v1409_v44 = vld [vmem:[%s1923_s19 + $0x24] sm:$0xf]  ;;  %v1226_v45 = vld [vmem:[%s1923_s19 + $0x28] sm:$0xf0]  ;;  %v1225_v48 = vor.u32 %v1410_v41, %v1224_v40 }
  0x36   : > { %654 = vmatpush.bf16.msra.mxu0 %v1441_v6  ;;  %1552 = vmatpush.bf16.msra.mxu2 %v1441_v6  ;;  %v1425_v46 = vld [vmem:[%s1923_s19 + $0xa4] sm:$0xf]  ;;  %v1290_v47 = vld [vmem:[%s1923_s19 + $0xa8] sm:$0xf0]  ;;  %v1289_v49 = vor.u32 %v1426_v43, %v1288_v42  ;;  %v1229_v50 = vor.u32 %v1409_v44, %v1226_v45  ;;  %v1232_v52 = vld [vmem:[%s1923_s19 + $0x30] sm:$0xf] }
  0x37   : > { %743 = vmatpush.bf16.msra.mxu1 %v1449_v7  ;;  %1560 = vmatpush.bf16.msra.mxu3 %v1449_v7  ;;  %v1293_v51 = vor.u32 %v1425_v46, %v1290_v47  ;;  %v1412_v53 = vld [vmem:[%s1923_s19 + $0x34] sm:$0xf0]  ;;  %v1296_v54 = vld [vmem:[%s1923_s19 + $0xb0] sm:$0xf]  ;;  %v1411_v56 = vld [vmem:[%s1923_s19 + $0x34] sm:$0xf] }
  0x38   : > { %v1428_v55 = vld [vmem:[%s1923_s19 + $0xb4] sm:$0xf0]  ;;  %v1234_v57 = vld [vmem:[%s1923_s19 + $0x38] sm:$0xf0]  ;;  %v1427_v58 = vld [vmem:[%s1923_s19 + $0xb4] sm:$0xf]  ;;  %v1233_v60 = vor.u32 %v1412_v53, %v1232_v52 }
  0x39   : > { %v1298_v59 = vld [vmem:[%s1923_s19 + $0xb8] sm:$0xf0]  ;;  %v1297_v61 = vor.u32 %v1428_v55, %v1296_v54  ;;  %v1237_v62 = vor.u32 %v1411_v56, %v1234_v57  ;;  %v1240_v0 = vld [vmem:[%s1923_s19 + $0x40] sm:$0xf]  ;;  %v1414_v1 = vld [vmem:[%s1923_s19 + $0x44] sm:$0xf0] }
  0x3a   : > { %655 = vmatpush.bf16.msra.mxu0 %v1440_v8  ;;  %1553 = vmatpush.bf16.msra.mxu2 %v1440_v8  ;;  %v1301_v63 = vor.u32 %v1427_v58, %v1298_v59  ;;  %v1304_v2 = vld [vmem:[%s1923_s19 + $0xc0] sm:$0xf]  ;;  %v1430_v3 = vld [vmem:[%s1923_s19 + $0xc4] sm:$0xf0]  ;;  %v1413_v4 = vld [vmem:[%s1923_s19 + $0x44] sm:$0xf]  ;;  %v1241_v8 = vor.u32 %v1414_v1, %v1240_v0 }
  0x3b   : > { %744 = vmatpush.bf16.msra.mxu1 %v1448_v9  ;;  %1561 = vmatpush.bf16.msra.mxu3 %v1448_v9  ;;  %v1242_v5 = vld [vmem:[%s1923_s19 + $0x48] sm:$0xf0]  ;;  %v1429_v6 = vld [vmem:[%s1923_s19 + $0xc4] sm:$0xf]  ;;  %v1305_v9 = vor.u32 %v1430_v3, %v1304_v2  ;;  %v1415_v16 = vld [vmem:[%s1923_s19 + $0x54] sm:$0xf] }
  0x3c   : > { %v1306_v7 = vld [vmem:[%s1923_s19 + $0xc8] sm:$0xf0]  ;;  %v1250_v17 = vld [vmem:[%s1923_s19 + $0x58] sm:$0xf0]  ;;  %v1431_v18 = vld [vmem:[%s1923_s19 + $0xd4] sm:$0xf] }
  0x3d   : > { %v1314_v19 = vld [vmem:[%s1923_s19 + $0xd8] sm:$0xf0]  ;;  %v1253_v22 = vor.u32 %v1415_v16, %v1250_v17  ;;  %v1417_v28 = vld [vmem:[%s1923_s19 + $0x64] sm:$0xf]  ;;  %v1258_v29 = vld [vmem:[%s1923_s19 + $0x68] sm:$0xf0] }
  0x3e   : > { %656 = vmatpush.bf16.msra.mxu0 %v1439_v10  ;;  %1554 = vmatpush.bf16.msra.mxu2 %v1439_v10  ;;  %v1245_v10 = vor.u32 %v1413_v4, %v1242_v5  ;;  %v1317_v23 = vor.u32 %v1431_v18, %v1314_v19  ;;  %v1433_v30 = vld [vmem:[%s1923_s19 + $0xe4] sm:$0xf]  ;;  %v1322_v31 = vld [vmem:[%s1923_s19 + $0xe8] sm:$0xf0]  ;;  %v1261_v34 = vor.u32 %v1417_v28, %v1258_v29  ;;  %v1419_v40 = vld [vmem:[%s1923_s19 + $0x74] sm:$0xf] }
  0x3f   : > { %745 = vmatpush.bf16.msra.mxu1 %v1447_v11  ;;  %1562 = vmatpush.bf16.msra.mxu3 %v1447_v11  ;;  %v1309_v11 = vor.u32 %v1429_v6, %v1306_v7  ;;  %v1325_v35 = vor.u32 %v1433_v30, %v1322_v31  ;;  %v1266_v41 = vld [vmem:[%s1923_s19 + $0x78] sm:$0xf0]  ;;  %v1435_v42 = vld [vmem:[%s1923_s19 + $0xf4] sm:$0xf] }
  0x40   : > { %v1330_v43 = vld [vmem:[%s1923_s19 + $0xf8] sm:$0xf0]  ;;  %v1269_v46 = vor.u32 %v1419_v40, %v1266_v41 }
  0x41   : > { %v1333_v47 = vor.u32 %v1435_v42, %v1330_v43 }
  0x42   : > { %657 = vmatpush.bf16.msra.mxu0 %v1438_v12  ;;  %1555 = vmatpush.bf16.msra.mxu2 %v1438_v12  ;;  %v1248_v12 = vld [vmem:[%s1923_s19 + $0x50] sm:$0xf] }
  0x43   : > { %746 = vmatpush.bf16.msra.mxu1 %v1446_v13  ;;  %1563 = vmatpush.bf16.msra.mxu3 %v1446_v13  ;;  %v1416_v13 = vld [vmem:[%s1923_s19 + $0x54] sm:$0xf0] }
  0x44   : > { %v1249_v20 = vor.u32 %v1416_v13, %v1248_v12 }
  0x46   : > { %658 = vmatpush.bf16.msra.mxu0 %v1437_v14  ;;  %1556 = vmatpush.bf16.msra.mxu2 %v1437_v14  ;;  %v1312_v14 = vld [vmem:[%s1923_s19 + $0xd0] sm:$0xf] }
  0x47   : > { %747 = vmatpush.bf16.msra.mxu1 %v1445_v15  ;;  %1564 = vmatpush.bf16.msra.mxu3 %v1445_v15  ;;  %v1432_v15 = vld [vmem:[%s1923_s19 + $0xd4] sm:$0xf0] }
  0x48   : > { %v1313_v21 = vor.u32 %v1432_v15, %v1312_v14 }
  0x49   : > { %659 = vmatmul.bf16.vlgmr.msra.gmra.mxu0 %v1209_v24  ;;  %699 = vmatmul.bf16.vlgmr.msra.gmra.mxu2 %v1273_v25  ;;  %v1256_v24 = vld [vmem:[%s1923_s19 + $0x60] sm:$0xf]  ;;  %v1418_v25 = vld [vmem:[%s1923_s19 + $0x64] sm:$0xf0] }
  0x4a   : > { %748 = vmatmul.bf16.vlgmr.msra.gmra.mxu1 %v1213_v26  ;;  %788 = vmatmul.bf16.vlgmr.msra.gmra.mxu3 %v1277_v27  ;;  %v1320_v26 = vld [vmem:[%s1923_s19 + $0xe0] sm:$0xf]  ;;  %v1434_v27 = vld [vmem:[%s1923_s19 + $0xe4] sm:$0xf0]  ;;  %v1257_v32 = vor.u32 %v1418_v25, %v1256_v24 }
  0x4b   : > { %v1321_v33 = vor.u32 %v1434_v27, %v1320_v26 }
  0x59   : > { %664 = vmatmul.bf16.gmra.mxu0 %v1217_v36  ;;  %704 = vmatmul.bf16.gmra.mxu2 %v1281_v37  ;;  %v1264_v36 = vld [vmem:[%s1923_s19 + $0x70] sm:$0xf]  ;;  %v1420_v37 = vld [vmem:[%s1923_s19 + $0x74] sm:$0xf0] }
  0x5a   : > { %753 = vmatmul.bf16.gmra.mxu1 %v1221_v38  ;;  %793 = vmatmul.bf16.gmra.mxu3 %v1285_v39  ;;  %v1328_v38 = vld [vmem:[%s1923_s19 + $0xf0] sm:$0xf]  ;;  %v1436_v39 = vld [vmem:[%s1923_s19 + $0xf4] sm:$0xf0]  ;;  %v1265_v44 = vor.u32 %v1420_v37, %v1264_v36 }
  0x5b   : > { %v1329_v45 = vor.u32 %v1436_v39, %v1328_v38 }
  0x69   : > { %669 = vmatmul.bf16.gmra.mxu0 %v1225_v48  ;;  %709 = vmatmul.bf16.gmra.mxu2 %v1289_v49 }
  0x6a   : > { %758 = vmatmul.bf16.gmra.mxu1 %v1229_v50  ;;  %798 = vmatmul.bf16.gmra.mxu3 %v1293_v51  ;;  %v2000_v51 = vld [vmem:[%s2094_s2] ss:$0 sm:$0xff] }
  0x79   : > { %674 = vmatmul.bf16.gmra.mxu0 %v1233_v60  ;;  %714 = vmatmul.bf16.gmra.mxu2 %v1297_v61 }
  0x7a   : > { %763 = vmatmul.bf16.gmra.mxu1 %v1237_v62  ;;  %803 = vmatmul.bf16.gmra.mxu3 %v1301_v63 }
  0x89   : > { %679 = vmatmul.bf16.gmra.mxu0 %v1241_v8  ;;  %719 = vmatmul.bf16.gmra.mxu2 %v1305_v9 }
  0x8a   : > { %768 = vmatmul.bf16.gmra.mxu1 %v1245_v10  ;;  %808 = vmatmul.bf16.gmra.mxu3 %v1309_v11 }
  0x99   : > { %684 = vmatmul.bf16.gmra.mxu0 %v1249_v20  ;;  %724 = vmatmul.bf16.gmra.mxu2 %v1313_v21 }
  0x9a   : > { %773 = vmatmul.bf16.gmra.mxu1 %v1253_v22  ;;  %813 = vmatmul.bf16.gmra.mxu3 %v1317_v23 }
  0xa9   : > { %689 = vmatmul.bf16.gmra.mxu0 %v1257_v32  ;;  %729 = vmatmul.bf16.gmra.mxu2 %v1321_v33 }
  0xaa   : > { %778 = vmatmul.bf16.gmra.mxu1 %v1261_v34  ;;  %818 = vmatmul.bf16.gmra.mxu3 %v1325_v35 }
  0xb9   : > { %694 = vmatmul.bf16.gmra.mxu0 %v1265_v44  ;;  %734 = vmatmul.bf16.gmra.mxu2 %v1329_v45 }
  0xba   : > { %783 = vmatmul.bf16.gmra.mxu1 %v1269_v46  ;;  %823 = vmatmul.bf16.gmra.mxu3 %v1333_v47 }
  0xc6   : > { %v660_v48 = vpop.f32.mrf.mxu0 }
  0xc7   : > { %v749_v49 = vpop.f32.mrf.mxu1 }
  0xc8   : > { %v750_v50 = vadd.f32 %v749_v49, %v660_v48 }
  0xca   : > { %v932_v56 = vadd.f32 %v2000_v51, %v750_v50 }
  0xcc   : > { %v700_v52 = vpop.f32.mrf.mxu2  ;;  %v964_v60 = vmax.f32 %v932_v56, 0.0 }
  0xcd   : > { %v789_v53 = vpop.f32.mrf.mxu3 }
  0xce   : > { %v662_v54 = vpop.f32.mrf.mxu0  ;;  %v790_v58 = vadd.f32 %v789_v53, %v700_v52 }
  0xcf   : > { %v751_v55 = vpop.f32.mrf.mxu1 }
  0xd0   : > { %v752_v57 = vadd.f32 %v751_v55, %v662_v54  ;;  %v948_v0 = vadd.f32 %v2000_v51, %v790_v58 }
  0xd2   : > { %v933_v59 = vadd.f32 %v2000_v51, %v752_v57  ;;  %v980_v6 = vmax.f32 %v948_v0, 0.0 }
  0xd4   : > { %v965_v61 = vmax.f32 %v933_v59, 0.0  ;;  %v702_v62 = vpop.f32.mrf.mxu2 }
  0xd5   : > { %v791_v63 = vpop.f32.mrf.mxu3 }
  0xd6   : > { %v1457_v1 = vpack.c.bf16 %v965_v61, %v964_v60  ;;  %v792_v2 = vadd.f32 %v791_v63, %v702_v62  ;;  %v665_v3 = vpop.f32.mrf.mxu0 }
  0xd7   : > { %v754_v4 = vpop.f32.mrf.mxu1 }
  0xd8   : > { %1458 = vst [vmem:[%s2006_s27] sm:$0xff] %v1457_v1   ;;  %v949_v5 = vadd.f32 %v2000_v51, %v792_v2  ;;  %v755_v9 = vadd.f32 %v754_v4, %v665_v3 }
  0xda   : > { %v981_v7 = vmax.f32 %v949_v5, 0.0  ;;  %v934_v14 = vadd.f32 %v2000_v51, %v755_v9 }
  0xdc   : > { %v1497_v8 = vpack.c.bf16 %v981_v7, %v980_v6  ;;  %v705_v10 = vpop.f32.mrf.mxu2  ;;  %v966_v18 = vmax.f32 %v934_v14, 0.0 }
  0xdd   : > { %v794_v11 = vpop.f32.mrf.mxu3 }
  0xde   : > { %1541 = vst [vmem:[%s2006_s27 + $0x40] sm:$0xff] %v1497_v8   ;;  %v667_v12 = vpop.f32.mrf.mxu0  ;;  %v795_v16 = vadd.f32 %v794_v11, %v705_v10 }
  0xdf   : > { %v756_v13 = vpop.f32.mrf.mxu1 }
  0xe0   : > { %v757_v15 = vadd.f32 %v756_v13, %v667_v12  ;;  %v950_v22 = vadd.f32 %v2000_v51, %v795_v16 }
  0xe2   : > { %v935_v17 = vadd.f32 %v2000_v51, %v757_v15  ;;  %v982_v28 = vmax.f32 %v950_v22, 0.0 }
  0xe4   : > { %v967_v19 = vmax.f32 %v935_v17, 0.0  ;;  %v707_v20 = vpop.f32.mrf.mxu2 }
  0xe5   : > { %v796_v21 = vpop.f32.mrf.mxu3 }
  0xe6   : > { %v1462_v23 = vpack.c.bf16 %v967_v19, %v966_v18  ;;  %v797_v24 = vadd.f32 %v796_v21, %v707_v20  ;;  %v670_v25 = vpop.f32.mrf.mxu0 }
  0xe7   : > { %v759_v26 = vpop.f32.mrf.mxu1 }
  0xe8   : > { %1534 = vst [vmem:[%s2006_s27 + $0x8] sm:$0xff] %v1462_v23   ;;  %v951_v27 = vadd.f32 %v2000_v51, %v797_v24  ;;  %v760_v31 = vadd.f32 %v759_v26, %v670_v25 }
  0xea   : > { %v983_v29 = vmax.f32 %v951_v27, 0.0  ;;  %v936_v36 = vadd.f32 %v2000_v51, %v760_v31 }
  0xec   : > { %v1502_v30 = vpack.c.bf16 %v983_v29, %v982_v28  ;;  %v710_v32 = vpop.f32.mrf.mxu2  ;;  %v968_v40 = vmax.f32 %v936_v36, 0.0 }
  0xed   : > { %v799_v33 = vpop.f32.mrf.mxu3 }
  0xee   : > { %1542 = vst [vmem:[%s2006_s27 + $0x48] sm:$0xff] %v1502_v30   ;;  %v672_v34 = vpop.f32.mrf.mxu0  ;;  %v800_v38 = vadd.f32 %v799_v33, %v710_v32 }
  0xef   : > { %v761_v35 = vpop.f32.mrf.mxu1 }
  0xf0   : > { %v762_v37 = vadd.f32 %v761_v35, %v672_v34  ;;  %v952_v44 = vadd.f32 %v2000_v51, %v800_v38 }
  0xf2   : > { %v937_v39 = vadd.f32 %v2000_v51, %v762_v37  ;;  %v984_v50 = vmax.f32 %v952_v44, 0.0 }
  0xf4   : > { %v969_v41 = vmax.f32 %v937_v39, 0.0  ;;  %v712_v42 = vpop.f32.mrf.mxu2 }
  0xf5   : > { %v801_v43 = vpop.f32.mrf.mxu3 }
  0xf6   : > { %v1467_v45 = vpack.c.bf16 %v969_v41, %v968_v40  ;;  %v802_v46 = vadd.f32 %v801_v43, %v712_v42  ;;  %v675_v47 = vpop.f32.mrf.mxu0 }
  0xf7   : > { %v764_v48 = vpop.f32.mrf.mxu1 }
  0xf8   : > { %1535 = vst [vmem:[%s2006_s27 + $0x10] sm:$0xff] %v1467_v45   ;;  %v953_v49 = vadd.f32 %v2000_v51, %v802_v46  ;;  %v765_v54 = vadd.f32 %v764_v48, %v675_v47 }
  0xfa   : > { %v985_v52 = vmax.f32 %v953_v49, 0.0  ;;  %v938_v59 = vadd.f32 %v2000_v51, %v765_v54 }
  0xfc   : > { %v1507_v53 = vpack.c.bf16 %v985_v52, %v984_v50  ;;  %v715_v55 = vpop.f32.mrf.mxu2  ;;  %v970_v63 = vmax.f32 %v938_v59, 0.0 }
  0xfd   : > { %v804_v56 = vpop.f32.mrf.mxu3 }
  0xfe   : > { %1543 = vst [vmem:[%s2006_s27 + $0x50] sm:$0xff] %v1507_v53   ;;  %v677_v57 = vpop.f32.mrf.mxu0  ;;  %v805_v61 = vadd.f32 %v804_v56, %v715_v55 }
  0xff   : > { %v766_v58 = vpop.f32.mrf.mxu1 }
 0x100   : > { %v767_v60 = vadd.f32 %v766_v58, %v677_v57  ;;  %v954_v3 = vadd.f32 %v2000_v51, %v805_v61 }
 0x102   : > { %v939_v62 = vadd.f32 %v2000_v51, %v767_v60  ;;  %v986_v9 = vmax.f32 %v954_v3, 0.0 }
 0x104   : > { %v971_v0 = vmax.f32 %v939_v62, 0.0  ;;  %v717_v1 = vpop.f32.mrf.mxu2 }
 0x105   : > { %v806_v2 = vpop.f32.mrf.mxu3 }
 0x106   : > { %v1472_v4 = vpack.c.bf16 %v971_v0, %v970_v63  ;;  %v807_v5 = vadd.f32 %v806_v2, %v717_v1  ;;  %v680_v6 = vpop.f32.mrf.mxu0 }
 0x107   : > { %v769_v7 = vpop.f32.mrf.mxu1 }
 0x108   : > { %1536 = vst [vmem:[%s2006_s27 + $0x18] sm:$0xff] %v1472_v4   ;;  %v955_v8 = vadd.f32 %v2000_v51, %v807_v5  ;;  %v770_v12 = vadd.f32 %v769_v7, %v680_v6 }
 0x10a   : > { %v987_v10 = vmax.f32 %v955_v8, 0.0  ;;  %v940_v17 = vadd.f32 %v2000_v51, %v770_v12 }
 0x10c   : > { %v1512_v11 = vpack.c.bf16 %v987_v10, %v986_v9  ;;  %v720_v13 = vpop.f32.mrf.mxu2  ;;  %v972_v21 = vmax.f32 %v940_v17, 0.0 }
 0x10d   : > { %v809_v14 = vpop.f32.mrf.mxu3 }
 0x10e   : > { %1544 = vst [vmem:[%s2006_s27 + $0x58] sm:$0xff] %v1512_v11   ;;  %v682_v15 = vpop.f32.mrf.mxu0  ;;  %v810_v19 = vadd.f32 %v809_v14, %v720_v13 }
 0x10f   : > { %v771_v16 = vpop.f32.mrf.mxu1 }
 0x110   : > { %v772_v18 = vadd.f32 %v771_v16, %v682_v15  ;;  %v956_v25 = vadd.f32 %v2000_v51, %v810_v19 }
 0x112   : > { %v941_v20 = vadd.f32 %v2000_v51, %v772_v18  ;;  %v988_v31 = vmax.f32 %v956_v25, 0.0 }
 0x114   : > { %v973_v22 = vmax.f32 %v941_v20, 0.0  ;;  %v722_v23 = vpop.f32.mrf.mxu2 }
 0x115   : > { %v811_v24 = vpop.f32.mrf.mxu3 }
 0x116   : > { %v1477_v26 = vpack.c.bf16 %v973_v22, %v972_v21  ;;  %v812_v27 = vadd.f32 %v811_v24, %v722_v23  ;;  %v685_v28 = vpop.f32.mrf.mxu0 }
 0x117   : > { %v774_v29 = vpop.f32.mrf.mxu1 }
 0x118   : > { %1537 = vst [vmem:[%s2006_s27 + $0x20] sm:$0xff] %v1477_v26   ;;  %v957_v30 = vadd.f32 %v2000_v51, %v812_v27  ;;  %v775_v34 = vadd.f32 %v774_v29, %v685_v28 }
 0x11a   : > { %v989_v32 = vmax.f32 %v957_v30, 0.0  ;;  %v942_v39 = vadd.f32 %v2000_v51, %v775_v34 }
 0x11c   : > { %v1517_v33 = vpack.c.bf16 %v989_v32, %v988_v31  ;;  %v725_v35 = vpop.f32.mrf.mxu2  ;;  %v974_v43 = vmax.f32 %v942_v39, 0.0 }
 0x11d   : > { %v814_v36 = vpop.f32.mrf.mxu3 }
 0x11e   : > { %1545 = vst [vmem:[%s2006_s27 + $0x60] sm:$0xff] %v1517_v33   ;;  %v687_v37 = vpop.f32.mrf.mxu0  ;;  %v815_v41 = vadd.f32 %v814_v36, %v725_v35 }
 0x11f   : > { %v776_v38 = vpop.f32.mrf.mxu1 }
 0x120   : > { %v777_v40 = vadd.f32 %v776_v38, %v687_v37  ;;  %v958_v47 = vadd.f32 %v2000_v51, %v815_v41 }
 0x122   : > { %v943_v42 = vadd.f32 %v2000_v51, %v777_v40  ;;  %v990_v54 = vmax.f32 %v958_v47, 0.0 }
 0x124   : > { %v975_v44 = vmax.f32 %v943_v42, 0.0  ;;  %v727_v45 = vpop.f32.mrf.mxu2 }
 0x125   : > { %v816_v46 = vpop.f32.mrf.mxu3 }
 0x126   : > { %v1482_v48 = vpack.c.bf16 %v975_v44, %v974_v43  ;;  %v817_v49 = vadd.f32 %v816_v46, %v727_v45  ;;  %v690_v50 = vpop.f32.mrf.mxu0 }
 0x127   : > { %v779_v52 = vpop.f32.mrf.mxu1 }
 0x128   : > { %1538 = vst [vmem:[%s2006_s27 + $0x28] sm:$0xff] %v1482_v48   ;;  %v959_v53 = vadd.f32 %v2000_v51, %v817_v49  ;;  %v780_v57 = vadd.f32 %v779_v52, %v690_v50 }
 0x12a   : > { %v991_v55 = vmax.f32 %v959_v53, 0.0  ;;  %v944_v62 = vadd.f32 %v2000_v51, %v780_v57 }
 0x12c   : > { %v1522_v56 = vpack.c.bf16 %v991_v55, %v990_v54  ;;  %v730_v58 = vpop.f32.mrf.mxu2  ;;  %v976_v2 = vmax.f32 %v944_v62, 0.0 }
 0x12d   : > { %v819_v59 = vpop.f32.mrf.mxu3 }
 0x12e   : > { %1546 = vst [vmem:[%s2006_s27 + $0x68] sm:$0xff] %v1522_v56   ;;  %v692_v60 = vpop.f32.mrf.mxu0  ;;  %v820_v0 = vadd.f32 %v819_v59, %v730_v58 }
 0x12f   : > { %v781_v61 = vpop.f32.mrf.mxu1 }
 0x130   : > { %v782_v63 = vadd.f32 %v781_v61, %v692_v60  ;;  %v960_v6 = vadd.f32 %v2000_v51, %v820_v0 }
 0x132   : > { %v945_v1 = vadd.f32 %v2000_v51, %v782_v63  ;;  %v992_v12 = vmax.f32 %v960_v6, 0.0 }
 0x134   : > { %v977_v3 = vmax.f32 %v945_v1, 0.0  ;;  %v732_v4 = vpop.f32.mrf.mxu2 }
 0x135   : > { %v821_v5 = vpop.f32.mrf.mxu3 }
 0x136   : > { %v1487_v7 = vpack.c.bf16 %v977_v3, %v976_v2  ;;  %v822_v8 = vadd.f32 %v821_v5, %v732_v4  ;;  %v695_v9 = vpop.f32.mrf.mxu0 }
 0x137   : > { %v784_v10 = vpop.f32.mrf.mxu1 }
 0x138   : > { %1539 = vst [vmem:[%s2006_s27 + $0x30] sm:$0xff] %v1487_v7   ;;  %v961_v11 = vadd.f32 %v2000_v51, %v822_v8  ;;  %v785_v15 = vadd.f32 %v784_v10, %v695_v9 }
 0x13a   : > { %v993_v13 = vmax.f32 %v961_v11, 0.0  ;;  %v946_v20 = vadd.f32 %v2000_v51, %v785_v15 }
 0x13c   : > { %v1527_v14 = vpack.c.bf16 %v993_v13, %v992_v12  ;;  %v735_v16 = vpop.f32.mrf.mxu2  ;;  %v978_v24 = vmax.f32 %v946_v20, 0.0 }
 0x13d   : > { %v824_v17 = vpop.f32.mrf.mxu3 }
 0x13e   : > { %1547 = vst [vmem:[%s2006_s27 + $0x70] sm:$0xff] %v1527_v14   ;;  %v697_v18 = vpop.f32.mrf.mxu0  ;;  %v825_v22 = vadd.f32 %v824_v17, %v735_v16 }
 0x13f   : > { %v786_v19 = vpop.f32.mrf.mxu1 }
 0x140   : > { %v787_v21 = vadd.f32 %v786_v19, %v697_v18  ;;  %v962_v28 = vadd.f32 %v2000_v51, %v825_v22 }
 0x142   : > { %v947_v23 = vadd.f32 %v2000_v51, %v787_v21  ;;  %v994_v32 = vmax.f32 %v962_v28, 0.0 }
 0x144   : > { %v979_v25 = vmax.f32 %v947_v23, 0.0  ;;  %v737_v26 = vpop.f32.mrf.mxu2 }
 0x145   : > { %v826_v27 = vpop.f32.mrf.mxu3 }
 0x146   : > { %v1492_v29 = vpack.c.bf16 %v979_v25, %v978_v24  ;;  %v827_v30 = vadd.f32 %v826_v27, %v737_v26 }
 0x148   : > { %1540 = vst [vmem:[%s2006_s27 + $0x38] sm:$0xff] %v1492_v29   ;;  %v963_v31 = vadd.f32 %v2000_v51, %v827_v30 }
 0x14a   : > { %v995_v33 = vmax.f32 %v963_v31, 0.0 }
 0x14c   : > { %v1532_v34 = vpack.c.bf16 %v995_v33, %v994_v32 }
 0x14e   : > { %1548 = vst [vmem:[%s2006_s27 + $0x78] sm:$0xff] %v1532_v34  }
 0x14f   : > { %1732 = shalt.err (!%p1729_p0)
}
 0x150   : > { %s1798_s6 = smov 64   ;;  %s1799_s1 = smov 4  }
 0x151   : > { %1571 = dma.vmem_to_hbm [thread:$0]  (%p1899_p5), %s1075_s26, 2048, %s1077_s15, %s1061_s28, %s1798_s6, %s1798_s6, %s1799_s1  }
 0x152 PF: > { %s1091_s20 = sand.u32 1, %s1771_s12   ;;  %p1582_p3 = pnand %p1197_p11, %p1869_p6 }
 0x153   : > { %s1092_s22 = scalar_lea.sflag [#allocation5], %s1091_s20 }
 0x154   : > { %p1583_p7 = pneg %p1582_p3 }
 0x156   : > { %1766 = dma.done.wait (%p1583_p7), %s1092_s22, 2048  }
 0x157   : > { %1768 = vsyncadd (%p1583_p7), %s1092_s22, 4294965248  ;;  %s20_s17 = sadd.s32 1, %s1791_s17   ;;  %s2105_s12 = smov %s1775_s13 }
 0x158   : > { %p17_p9 = scmp.ge.s32.totalorder %s20_s17, 4   ;;  %s2106_s13 = smov %s1779_s14 }
 0x159   : > { %s2107_s14 = smov %s1908_s18  ;;  %s2108_s15 = smov %s1787_s16 }
 0x15a   : > { %s2109_s16 = smov %s2111_s5  ;;  %19 = sbr.rel (!%p17_p9) target bundleno = 9 (0x9), region = 93 }
 0x15f   :  { %1098 = vsyncpa [#allocation4], 1 }
 0x160   :  { %1100 = vsyncpa [#allocation4 + $0x1], 1 }
 0x161   :  { %1101 = vsyncpa [#allocation7], 1 }
 0x162   :  { %1102 = vsyncpa [#allocation5], 1 }
 0x163   :  { %1104 = vsyncpa [#allocation5 + $0x1], 1 }

</bundles_post_ra>
